<compile_context>
chip_gen: v7x
topology: tpu7x:2x2x1
jax: 0.10.0
libtpu: 0.0.40
codegen_flags: <defaults>
</compile_context>

<pallas_src>
import functools

import jax
import jax.numpy as jnp
from jax.experimental import pallas as pl
from jax.experimental.pallas import tpu as pltpu


def agent_kernel(ent_ref, bias_ref,
                 w1_ref, b1_ref, wq_ref, wk_ref, wv_ref,
                 wow2_ref, b2_ref, wh_ref, bh_ref,
                 q_out_ref, h_out_ref, *, tb, ne, na_rows):
    # ent_ref:  (tb*ne, ed) bf16 entity slab
    # bias_ref: (tb, na_rows, ne) bf16 additive attention bias (0 keep / -1e9 masked)
    d = wq_ref.shape[1]

    # EntityBase.fc1 + ReLU on the full entity slab (bf16 MXU, f32 accumulate).
    x1 = jnp.maximum(
        jnp.dot(ent_ref[...], w1_ref[...], preferred_element_type=jnp.float32) + b1_ref[...],
        0.0).astype(jnp.bfloat16)

    # Query rows restricted to the agent rows (outputs below n_agents are all the module
    # keeps); keys/values use all entities.
    if na_rows == ne:
        xq = x1
    else:
        xq = x1.reshape(tb, ne, d)[:, :na_rows, :].reshape(tb * na_rows, d)

    # Separate, lane-aligned Q/K/V projections. 1/sqrt(d) is pre-folded into wq.
    qh = jnp.dot(xq, wq_ref[...], preferred_element_type=jnp.float32)
    kh = jnp.dot(x1, wk_ref[...], preferred_element_type=jnp.float32)
    vh = jnp.dot(x1, wv_ref[...], preferred_element_type=jnp.float32)

    qh = qh.astype(jnp.bfloat16).reshape(tb, na_rows, d)
    kh = kh.astype(jnp.bfloat16).reshape(tb, ne, d)
    vh = vh.astype(jnp.bfloat16).reshape(tb, ne, d)

    # Masked single-head entity self-attention, batched over the TILE_BT slots.
    scores = jnp.einsum('bqd,bkd->bqk', qh, kh,
                        preferred_element_type=jnp.float32)           # (tb, na_rows, ne)
    scores = scores + bias_ref[...].astype(jnp.float32)
    scores = scores - jnp.max(scores, axis=-1, keepdims=True)
    p = jnp.exp(scores)
    inv = pl.reciprocal(jnp.sum(p, axis=-1, keepdims=True), approx=True)
    attn = (p * inv).astype(jnp.bfloat16)

    ao = jnp.einsum('bqk,bkd->bqd', attn, vh,
                    preferred_element_type=jnp.float32)               # (tb, na_rows, d)
    ao = ao.reshape(tb * na_rows, d).astype(jnp.bfloat16)

    # (attn_out @ wo) @ w2 fused into one matmul (wow2 = wo @ w2 precomputed on host),
    # + b2 + ReLU, then the feedforward head.
    h_ag = jnp.maximum(
        jnp.dot(ao, wow2_ref[...], preferred_element_type=jnp.float32) + b2_ref[...], 0.0)
    q_ag = jnp.dot(h_ag.astype(jnp.bfloat16), wh_ref[...],
                   preferred_element_type=jnp.float32) + bh_ref[...]

    # 2D slab stores (agent rows only); (bs, ts, n_agents, ...) reshape happens in wrapper.
    q_out_ref[...] = q_ag
    h_out_ref[...] = h_ag


def _round_up(x, m):
    return (x + m - 1) // m * m


def agent_forward(params, entities, obs_mask, entity_mask, *, n_agents):
    bs, ts, ne, ed = entities.shape
    d = params["w1"].shape[1]          # attn_embed_dim
    rnn = params["w2"].shape[1]        # rnn_hidden_dim
    na = params["wh"].shape[1]         # n_actions
    bt = bs * ts

    ne_p = _round_up(ne, 8)            # padded entity axis (padded keys are masked)
    na_rows = _round_up(n_agents, 8)   # agent-query rows kept per slot (<= ne_p)

    # TILE_BT: multiple of 8, capped at 256; large bt automatically yields >=2 grid steps
    # on the "parallel" axis (v7x megacore), small bt runs in a single maximal tile.
    max_tile = 256
    n_tiles0 = max(1, -(-bt // max_tile))
    tile_bt = min(max_tile, _round_up(max(8, -(-bt // n_tiles0)), 8))
    n_tiles = -(-bt // tile_bt)
    bt_p = n_tiles * tile_bt

    # ---- host-side data prep ------------------------------------------------------------
    ent = entities.reshape(bt, ne, ed).astype(jnp.float32)
    if ne_p != ne:
        ent = jnp.pad(ent, ((0, 0), (0, ne_p - ne), (0, 0)))
    if bt_p != bt:
        ent = jnp.pad(ent, ((0, bt_p - bt), (0, 0), (0, 0)))
    ent2d = ent.reshape(bt_p * ne_p, ed).astype(jnp.bfloat16)

    # obs_mask (1 => cannot attend) -> additive bias 0 / -1e9, agent-query rows only, bf16.
    om = obs_mask.reshape(bt, ne, ne).astype(jnp.float32)
    bias = jnp.where(om > 0.0, jnp.float32(-1e9), jnp.float32(0.0))
    if ne_p != ne:
        bias = jnp.pad(bias, ((0, 0), (0, ne_p - ne), (0, ne_p - ne)),
                       constant_values=-1e9)
    bias = bias[:, :na_rows, :]
    if bt_p != bt:
        bias = jnp.pad(bias, ((0, bt_p - bt), (0, 0), (0, 0)))
    bias = bias.astype(jnp.bfloat16)

    # ---- host-side weight prep (algebraic fusions) ---------------------------------------
    bf = lambda w: w.astype(jnp.bfloat16)
    scale = 1.0 / (d ** 0.5)
    wq_s = params["wq"] * scale                             # fold 1/sqrt(d) into wq
    wow2 = params["wo"] @ params["w2"]                      # fuse attn-out proj with fc2

    kernel = functools.partial(agent_kernel, tb=tile_bt, ne=ne_p, na_rows=na_rows)
    rows = tile_bt * ne_p
    arow = tile_bt * na_rows

    q2d, h2d = pl.pallas_call(
        kernel,
        out_shape=(jax.ShapeDtypeStruct((bt_p * na_rows, na), jnp.float32),
                   jax.ShapeDtypeStruct((bt_p * na_rows, rnn), jnp.float32)),
        grid=(n_tiles,),
        in_specs=[
            pl.BlockSpec((rows, ed), lambda i: (i, 0)),                 # entity slab (bf16)
            pl.BlockSpec((tile_bt, na_rows, ne_p), lambda i: (i, 0, 0)),  # attn bias (bf16)
            pl.BlockSpec((ed, d), lambda i: (0, 0)),                    # w1
            pl.BlockSpec((1, d), lambda i: (0, 0)),                     # b1
            pl.BlockSpec((d, d), lambda i: (0, 0)),                     # wq (pre-scaled)
            pl.BlockSpec((d, d), lambda i: (0, 0)),                     # wk
            pl.BlockSpec((d, d), lambda i: (0, 0)),                     # wv
            pl.BlockSpec((d, rnn), lambda i: (0, 0)),                   # wo @ w2 fused
            pl.BlockSpec((1, rnn), lambda i: (0, 0)),                   # b2
            pl.BlockSpec((rnn, na), lambda i: (0, 0)),                  # wh (head)
            pl.BlockSpec((1, na), lambda i: (0, 0)),                    # bh (head)
        ],
        out_specs=(pl.BlockSpec((arow, na), lambda i: (i, 0)),
                   pl.BlockSpec((arow, rnn), lambda i: (i, 0))),
        compiler_params=pltpu.CompilerParams(
            dimension_semantics=("parallel",),
            vmem_limit_bytes=48 * 1024 * 1024),
    )(ent2d, bias,
      bf(params["w1"]), params["b1"], bf(wq_s), bf(params["wk"]), bf(params["wv"]),
      bf(wow2), params["b2"], bf(params["wh"]), params["bh"])

    q = q2d.reshape(bt_p, na_rows, na)[:bt, :n_agents, :].reshape(bs, ts, n_agents, na)
    h = h2d.reshape(bt_p, na_rows, rnn)[:bt, :n_agents, :].reshape(bs, ts, n_agents, rnn)

    # q.masked_fill(agent_mask.unsqueeze(3), 0) applied on the small, already-sliced output.
    agent_mask = entity_mask[:, :, :n_agents].astype(jnp.float32)
    q = jnp.where(agent_mask[..., None] > 0.0, 0.0, q)

    info = {}
    return q, h, info


def init_params(key, *, input_shape, attn_embed_dim, rnn_hidden_dim, n_actions):
    ks = jax.random.split(key, 9)
    s = 0.1

    def w(k, shape):
        return jax.random.normal(k, shape, dtype=jnp.float32) * s

    return {
        "w1": w(ks[0], (input_shape, attn_embed_dim)),
        "b1": jnp.zeros((1, attn_embed_dim), jnp.float32),
        "wq": w(ks[1], (attn_embed_dim, attn_embed_dim)),
        "wk": w(ks[2], (attn_embed_dim, attn_embed_dim)),
        "wv": w(ks[3], (attn_embed_dim, attn_embed_dim)),
        "wo": w(ks[4], (attn_embed_dim, attn_embed_dim)),
        "w2": w(ks[5], (attn_embed_dim, rnn_hidden_dim)),
        "b2": jnp.zeros((1, rnn_hidden_dim), jnp.float32),
        "wh": w(ks[6], (rnn_hidden_dim, n_actions)),
        "bh": jnp.zeros((1, n_actions), jnp.float32),
    }


if __name__ == "__main__":
    # Small, module-consistent shapes.
    bs, ts, ne, ed = 2, 2, 8, 16          # batch, time, n_entities, entity feature dim
    n_agents, n_actions = 4, 8
    attn_embed_dim, rnn_hidden_dim = 32, 32

    key = jax.random.PRNGKey(0)
    k_ent, k_obs, k_param = jax.random.split(key, 3)

    entities = jax.random.normal(k_ent, (bs, ts, ne, ed), dtype=jnp.float32)
    # obs_mask: 1 => entity j NOT observable by entity i; keep diagonal observable.
    obs_mask = jax.random.bernoulli(k_obs, p=0.3, shape=(bs, ts, ne, ne)).astype(jnp.float32)
    eye = jnp.eye(ne, dtype=jnp.float32)[None, None]
    obs_mask = obs_mask * (1.0 - eye)
    # entity_mask: 1 => inactive entity (mask last two entities and one agent).
    entity_mask = jnp.zeros((bs, ts, ne), jnp.float32)
    entity_mask = entity_mask.at[:, :, -2:].set(1.0)
    entity_mask = entity_mask.at[1, :, n_agents - 1].set(1.0)

    params = init_params(k_param, input_shape=ed, attn_embed_dim=attn_embed_dim,
                         rnn_hidden_dim=rnn_hidden_dim, n_actions=n_actions)

    q, h, info = agent_forward(params, entities, obs_mask, entity_mask, n_agents=n_agents)
    jax.block_until_ready((q, h))

    assert q.shape == (bs, ts, n_agents, n_actions)
    assert h.shape == (bs, ts, n_agents, rnn_hidden_dim)
    # masked agent rows must be exactly zero
    assert float(jnp.abs(q[1, :, n_agents - 1, :]).max()) == 0.0
    assert bool(jnp.all(jnp.isfinite(q))) and bool(jnp.all(jnp.isfinite(h)))

    print("KERNEL_OK")
</pallas_src>

<mosaic_0001>
module attributes {stable_mosaic.version = 11 : i64} {
  func.func @agent_kernel(%arg0: i32, %arg1: memref<64x16xbf16, #tpu.memory_space<vmem>>, %arg2: memref<8x8x8xbf16, #tpu.memory_space<vmem>>, %arg3: memref<16x32xbf16, #tpu.memory_space<vmem>>, %arg4: memref<1x32xf32, #tpu.memory_space<vmem>>, %arg5: memref<32x32xbf16, #tpu.memory_space<vmem>>, %arg6: memref<32x32xbf16, #tpu.memory_space<vmem>>, %arg7: memref<32x32xbf16, #tpu.memory_space<vmem>>, %arg8: memref<32x32xbf16, #tpu.memory_space<vmem>>, %arg9: memref<1x32xf32, #tpu.memory_space<vmem>>, %arg10: memref<32x8xbf16, #tpu.memory_space<vmem>>, %arg11: memref<1x8xf32, #tpu.memory_space<vmem>>, %arg12: memref<64x8xf32, #tpu.memory_space<vmem>>, %arg13: memref<64x32xf32, #tpu.memory_space<vmem>>) attributes {dimension_semantics = [#tpu.dimension_semantics<parallel>], iteration_bounds = array<i64: 1>, scalar_prefetch = 0 : i64, scratch_operands = 0 : i64, tpu.core_type = #tpu.core_type<tc>, window_params = [{transform_indices = @transform_0, window_bounds = array<i64: 64, 16>}, {transform_indices = @transform_1, window_bounds = array<i64: 8, 8, 8>}, {pipeline_mode = #tpu.pipeline_mode<synchronous>, transform_indices = @transform_2, window_bounds = array<i64: 16, 32>}, {pipeline_mode = #tpu.pipeline_mode<synchronous>, transform_indices = @transform_3, window_bounds = array<i64: 1, 32>}, {pipeline_mode = #tpu.pipeline_mode<synchronous>, transform_indices = @transform_4, window_bounds = array<i64: 32, 32>}, {pipeline_mode = #tpu.pipeline_mode<synchronous>, transform_indices = @transform_5, window_bounds = array<i64: 32, 32>}, {pipeline_mode = #tpu.pipeline_mode<synchronous>, transform_indices = @transform_6, window_bounds = array<i64: 32, 32>}, {pipeline_mode = #tpu.pipeline_mode<synchronous>, transform_indices = @transform_7, window_bounds = array<i64: 32, 32>}, {pipeline_mode = #tpu.pipeline_mode<synchronous>, transform_indices = @transform_8, window_bounds = array<i64: 1, 32>}, {pipeline_mode = #tpu.pipeline_mode<synchronous>, transform_indices = @transform_9, window_bounds = array<i64: 32, 8>}, {pipeline_mode = #tpu.pipeline_mode<synchronous>, transform_indices = @transform_10, window_bounds = array<i64: 1, 8>}, {transform_indices = @transform_11, window_bounds = array<i64: 64, 8>}, {transform_indices = @transform_12, window_bounds = array<i64: 64, 32>}]} {
    %c0 = arith.constant 0 : index
    %c0_0 = arith.constant 0 : index
    %0 = vector.load %arg1[%c0, %c0_0] : memref<64x16xbf16, #tpu.memory_space<vmem>>, vector<64x16xbf16>
    %c0_1 = arith.constant 0 : index
    %c0_2 = arith.constant 0 : index
    %1 = vector.load %arg3[%c0_1, %c0_2] : memref<16x32xbf16, #tpu.memory_space<vmem>>, vector<16x32xbf16>
    %cst = arith.constant dense<0.000000e+00> : vector<64x32xf32>
    %2 = tpu.matmul %0, %1, %cst {dimension_numbers = #tpu.dot_dimension_numbers<[1], [0], [0], [1], [0, 0, 1, 1], [], []>} : vector<64x16xbf16>, vector<16x32xbf16>, vector<64x32xf32> -> vector<64x32xf32>
    %c0_3 = arith.constant 0 : index
    %c0_4 = arith.constant 0 : index
    %3 = vector.load %arg4[%c0_3, %c0_4] : memref<1x32xf32, #tpu.memory_space<vmem>>, vector<1x32xf32>
    %4 = vector.broadcast %3 : vector<1x32xf32> to vector<64x32xf32>
    %5 = arith.addf %2, %4 : vector<64x32xf32>
    %cst_5 = arith.constant 0.000000e+00 : f32
    %6 = vector.broadcast %cst_5 : f32 to vector<64x32xf32>
    %7 = arith.maximumf %5, %6 : vector<64x32xf32>
    %8 = arith.truncf %7 : vector<64x32xf32> to vector<64x32xbf16>
    %c0_6 = arith.constant 0 : index
    %c0_7 = arith.constant 0 : index
    %9 = vector.load %arg5[%c0_6, %c0_7] : memref<32x32xbf16, #tpu.memory_space<vmem>>, vector<32x32xbf16>
    %cst_8 = arith.constant dense<0.000000e+00> : vector<64x32xf32>
    %10 = tpu.matmul %8, %9, %cst_8 {dimension_numbers = #tpu.dot_dimension_numbers<[1], [0], [0], [1], [0, 0, 1, 1], [], []>} : vector<64x32xbf16>, vector<32x32xbf16>, vector<64x32xf32> -> vector<64x32xf32>
    %c0_9 = arith.constant 0 : index
    %c0_10 = arith.constant 0 : index
    %11 = vector.load %arg6[%c0_9, %c0_10] : memref<32x32xbf16, #tpu.memory_space<vmem>>, vector<32x32xbf16>
    %cst_11 = arith.constant dense<0.000000e+00> : vector<64x32xf32>
    %12 = tpu.matmul %8, %11, %cst_11 {dimension_numbers = #tpu.dot_dimension_numbers<[1], [0], [0], [1], [0, 0, 1, 1], [], []>} : vector<64x32xbf16>, vector<32x32xbf16>, vector<64x32xf32> -> vector<64x32xf32>
    %c0_12 = arith.constant 0 : index
    %c0_13 = arith.constant 0 : index
    %13 = vector.load %arg7[%c0_12, %c0_13] : memref<32x32xbf16, #tpu.memory_space<vmem>>, vector<32x32xbf16>
    %cst_14 = arith.constant dense<0.000000e+00> : vector<64x32xf32>
    %14 = tpu.matmul %8, %13, %cst_14 {dimension_numbers = #tpu.dot_dimension_numbers<[1], [0], [0], [1], [0, 0, 1, 1], [], []>} : vector<64x32xbf16>, vector<32x32xbf16>, vector<64x32xf32> -> vector<64x32xf32>
    %15 = arith.truncf %10 : vector<64x32xf32> to vector<64x32xbf16>
    %16 = vector.shape_cast %15 : vector<64x32xbf16> to vector<8x8x32xbf16>
    %17 = arith.truncf %12 : vector<64x32xf32> to vector<64x32xbf16>
    %18 = vector.shape_cast %17 : vector<64x32xbf16> to vector<8x8x32xbf16>
    %19 = arith.truncf %14 : vector<64x32xf32> to vector<64x32xbf16>
    %20 = vector.shape_cast %19 : vector<64x32xbf16> to vector<8x8x32xbf16>
    "tpu.trace_start"() <{level = 10 : i32, message = "bqd,bkd->bqk"}> : () -> ()
    %cst_15 = arith.constant dense<0.000000e+00> : vector<8x8x8xf32>
    %21 = tpu.matmul %16, %18, %cst_15 {dimension_numbers = #tpu.dot_dimension_numbers<[2], [2], [1], [1], [0, 0, 0, 1, 1, 1], [0], [0]>} : vector<8x8x32xbf16>, vector<8x8x32xbf16>, vector<8x8x8xf32> -> vector<8x8x8xf32>
    "tpu.trace_stop"() : () -> ()
    %c0_16 = arith.constant 0 : index
    %c0_17 = arith.constant 0 : index
    %c0_18 = arith.constant 0 : index
    %22 = vector.load %arg2[%c0_16, %c0_17, %c0_18] : memref<8x8x8xbf16, #tpu.memory_space<vmem>>, vector<8x8x8xbf16>
    %23 = arith.extf %22 : vector<8x8x8xbf16> to vector<8x8x8xf32>
    %24 = arith.addf %21, %23 : vector<8x8x8xf32>
    %cst_19 = arith.constant dense<0xFF800000> : vector<8x8xf32>
    %25 = vector.multi_reduction <maximumf>, %24, %cst_19 [2] : vector<8x8x8xf32> to vector<8x8xf32>
    %26 = vector.shape_cast %25 : vector<8x8xf32> to vector<8x8x1xf32>
    %27 = vector.broadcast %26 : vector<8x8x1xf32> to vector<8x8x8xf32>
    %28 = arith.subf %24, %27 : vector<8x8x8xf32>
    %29 = math.exp %28 : vector<8x8x8xf32>
    %cst_20 = arith.constant dense<0.000000e+00> : vector<8x8xf32>
    %30 = vector.multi_reduction <add>, %29, %cst_20 [2] : vector<8x8x8xf32> to vector<8x8xf32>
    %31 = vector.shape_cast %30 : vector<8x8xf32> to vector<8x8x1xf32>
    %32 = tpu.reciprocal %31 {approx = true} : vector<8x8x1xf32> -> vector<8x8x1xf32>
    %33 = vector.broadcast %32 : vector<8x8x1xf32> to vector<8x8x8xf32>
    %34 = arith.mulf %29, %33 : vector<8x8x8xf32>
    %35 = arith.truncf %34 : vector<8x8x8xf32> to vector<8x8x8xbf16>
    "tpu.trace_start"() <{level = 10 : i32, message = "bqk,bkd->bqd"}> : () -> ()
    %cst_21 = arith.constant dense<0.000000e+00> : vector<8x8x32xf32>
    %36 = tpu.matmul %35, %20, %cst_21 {dimension_numbers = #tpu.dot_dimension_numbers<[2], [1], [1], [2], [0, 0, 0, 1, 1, 2], [0], [0]>} : vector<8x8x8xbf16>, vector<8x8x32xbf16>, vector<8x8x32xf32> -> vector<8x8x32xf32>
    "tpu.trace_stop"() : () -> ()
    %37 = vector.shape_cast %36 : vector<8x8x32xf32> to vector<64x32xf32>
    %38 = arith.truncf %37 : vector<64x32xf32> to vector<64x32xbf16>
    %c0_22 = arith.constant 0 : index
    %c0_23 = arith.constant 0 : index
    %39 = vector.load %arg8[%c0_22, %c0_23] : memref<32x32xbf16, #tpu.memory_space<vmem>>, vector<32x32xbf16>
    %cst_24 = arith.constant dense<0.000000e+00> : vector<64x32xf32>
    %40 = tpu.matmul %38, %39, %cst_24 {dimension_numbers = #tpu.dot_dimension_numbers<[1], [0], [0], [1], [0, 0, 1, 1], [], []>} : vector<64x32xbf16>, vector<32x32xbf16>, vector<64x32xf32> -> vector<64x32xf32>
    %c0_25 = arith.constant 0 : index
    %c0_26 = arith.constant 0 : index
    %41 = vector.load %arg9[%c0_25, %c0_26] : memref<1x32xf32, #tpu.memory_space<vmem>>, vector<1x32xf32>
    %42 = vector.broadcast %41 : vector<1x32xf32> to vector<64x32xf32>
    %43 = arith.addf %40, %42 : vector<64x32xf32>
    %cst_27 = arith.constant 0.000000e+00 : f32
    %44 = vector.broadcast %cst_27 : f32 to vector<64x32xf32>
    %45 = arith.maximumf %43, %44 : vector<64x32xf32>
    %46 = arith.truncf %45 : vector<64x32xf32> to vector<64x32xbf16>
    %c0_28 = arith.constant 0 : index
    %c0_29 = arith.constant 0 : index
    %47 = vector.load %arg10[%c0_28, %c0_29] : memref<32x8xbf16, #tpu.memory_space<vmem>>, vector<32x8xbf16>
    %cst_30 = arith.constant dense<0.000000e+00> : vector<64x8xf32>
    %48 = tpu.matmul %46, %47, %cst_30 {dimension_numbers = #tpu.dot_dimension_numbers<[1], [0], [0], [1], [0, 0, 1, 1], [], []>} : vector<64x32xbf16>, vector<32x8xbf16>, vector<64x8xf32> -> vector<64x8xf32>
    %c0_31 = arith.constant 0 : index
    %c0_32 = arith.constant 0 : index
    %49 = vector.load %arg11[%c0_31, %c0_32] : memref<1x8xf32, #tpu.memory_space<vmem>>, vector<1x8xf32>
    %50 = vector.broadcast %49 : vector<1x8xf32> to vector<64x8xf32>
    %51 = arith.addf %48, %50 : vector<64x8xf32>
    %c0_33 = arith.constant 0 : index
    %c0_34 = arith.constant 0 : index
    %52 = vector.load %arg12[%c0_33, %c0_34] : memref<64x8xf32, #tpu.memory_space<vmem>>, vector<64x8xf32>
    tpu.vector_store %arg12[%c0_33, %c0_34], %51 {strides = array<i32>} : memref<64x8xf32, #tpu.memory_space<vmem>>, vector<64x8xf32>,
    %c0_35 = arith.constant 0 : index
    %c0_36 = arith.constant 0 : index
    %53 = vector.load %arg13[%c0_35, %c0_36] : memref<64x32xf32, #tpu.memory_space<vmem>>, vector<64x32xf32>
    tpu.vector_store %arg13[%c0_35, %c0_36], %45 {strides = array<i32>} : memref<64x32xf32, #tpu.memory_space<vmem>>, vector<64x32xf32>,
    return
  }
  func.func @transform_0(%arg0: i32) -> (i32, i32) {
    %c0_i32 = arith.constant 0 : i32
    %c0_i32_0 = arith.constant 0 : i32
    return %arg0, %c0_i32 : i32, i32
  }
  func.func @transform_1(%arg0: i32) -> (i32, i32, i32) {
    %c0_i32 = arith.constant 0 : i32
    %c0_i32_0 = arith.constant 0 : i32
    %c0_i32_1 = arith.constant 0 : i32
    return %arg0, %c0_i32, %c0_i32_0 : i32, i32, i32
  }
  func.func @transform_2(%arg0: i32) -> (i32, i32) {
    %c0_i32 = arith.constant 0 : i32
    %c0_i32_0 = arith.constant 0 : i32
    %c0_i32_1 = arith.constant 0 : i32
    return %c0_i32, %c0_i32_0 : i32, i32
  }
  func.func @transform_3(%arg0: i32) -> (i32, i32) {
    %c0_i32 = arith.constant 0 : i32
    %c0_i32_0 = arith.constant 0 : i32
    %c0_i32_1 = arith.constant 0 : i32
    return %c0_i32, %c0_i32_0 : i32, i32
  }
  func.func @transform_4(%arg0: i32) -> (i32, i32) {
    %c0_i32 = arith.constant 0 : i32
    %c0_i32_0 = arith.constant 0 : i32
    %c0_i32_1 = arith.constant 0 : i32
    return %c0_i32, %c0_i32_0 : i32, i32
  }
  func.func @transform_5(%arg0: i32) -> (i32, i32) {
    %c0_i32 = arith.constant 0 : i32
    %c0_i32_0 = arith.constant 0 : i32
    %c0_i32_1 = arith.constant 0 : i32
    return %c0_i32, %c0_i32_0 : i32, i32
  }
  func.func @transform_6(%arg0: i32) -> (i32, i32) {
    %c0_i32 = arith.constant 0 : i32
    %c0_i32_0 = arith.constant 0 : i32
    %c0_i32_1 = arith.constant 0 : i32
    return %c0_i32, %c0_i32_0 : i32, i32
  }
  func.func @transform_7(%arg0: i32) -> (i32, i32) {
    %c0_i32 = arith.constant 0 : i32
    %c0_i32_0 = arith.constant 0 : i32
    %c0_i32_1 = arith.constant 0 : i32
    return %c0_i32, %c0_i32_0 : i32, i32
  }
  func.func @transform_8(%arg0: i32) -> (i32, i32) {
    %c0_i32 = arith.constant 0 : i32
    %c0_i32_0 = arith.constant 0 : i32
    %c0_i32_1 = arith.constant 0 : i32
    return %c0_i32, %c0_i32_0 : i32, i32
  }
  func.func @transform_9(%arg0: i32) -> (i32, i32) {
    %c0_i32 = arith.constant 0 : i32
    %c0_i32_0 = arith.constant 0 : i32
    %c0_i32_1 = arith.constant 0 : i32
    return %c0_i32, %c0_i32_0 : i32, i32
  }
  func.func @transform_10(%arg0: i32) -> (i32, i32) {
    %c0_i32 = arith.constant 0 : i32
    %c0_i32_0 = arith.constant 0 : i32
    %c0_i32_1 = arith.constant 0 : i32
    return %c0_i32, %c0_i32_0 : i32, i32
  }
  func.func @transform_11(%arg0: i32) -> (i32, i32) {
    %c0_i32 = arith.constant 0 : i32
    %c0_i32_0 = arith.constant 0 : i32
    return %arg0, %c0_i32 : i32, i32
  }
  func.func @transform_12(%arg0: i32) -> (i32, i32) {
    %c0_i32 = arith.constant 0 : i32
    %c0_i32_0 = arith.constant 0 : i32
    return %arg0, %c0_i32 : i32, i32
  }
}

</mosaic_0001>

<bundles_post_ra>
// kernel: tpu_custom_call.1
= control target key start
LH: loop header
LB: loop body
LE: loop exit
PB: predicated region body
PF: predicated region fallthrough
CT: control target
= control target key end

     0   :  { %18 = vsyncpa [#allocation3], 0  ;;  %s2451_s0 = inlined_call_operand.vmem [shape: bf16[64,16], index: 0, kind: input, shape index: {}]   ;;  %s2452_s1 = inlined_call_operand.vmem [shape: bf16[8,8,8], index: 1, kind: input, shape index: {}]   ;;  %s2453_s2 = inlined_call_operand.hbm [shape: bf16[16,32], index: 2, kind: input, shape index: {}]   ;;  %s2454_s3 = inlined_call_operand.vmem [shape: f32[1,32], index: 3, kind: input, shape index: {}]   ;;  %s2455_s4 = inlined_call_operand.vmem [shape: bf16[32,32], index: 4, kind: input, shape index: {}]   ;;  %s2456_s5 = inlined_call_operand.vmem [shape: bf16[32,32], index: 5, kind: input, shape index: {}]   ;;  %s2457_s6 = inlined_call_operand.vmem [shape: bf16[32,32], index: 6, kind: input, shape index: {}]   ;;  %s2458_s7 = inlined_call_operand.hbm [shape: bf16[32,32], index: 7, kind: input, shape index: {}]   ;;  %s2459_s8 = inlined_call_operand.vmem [shape: f32[1,32], index: 8, kind: input, shape index: {}]   ;;  %s2460_s9 = inlined_call_operand.vmem [shape: bf16[32,8], index: 9, kind: input, shape index: {}]   ;;  %s2461_s10 = inlined_call_operand.vmem [shape: f32[1,8], index: 10, kind: input, shape index: {}]   ;;  %s2462_s11 = inlined_call_operand.vmem [shape: f32[64,8], index: 11, kind: output, shape index: {0}]   ;;  %s2463_s12 = inlined_call_operand.vmem [shape: f32[64,32], index: 12, kind: output, shape index: {1}]  }
   0x1   :  { %19 = vsyncpa [#allocation5], 0  ;;  %s2081_s21 = smov [#allocation2]   ;;  %s2033_s25 = scalar_lea.hbm %s2453_s2, 128 }
   0x2   :  { %s29_s22 = sshll.u32 %s2081_s21, 4  ;;  %p2034_p0 = scmp.ne.s32.totalorder %s2453_s2, %s2033_s25  ;;  %s30_s22 = int_to_ptr.vmem [resolvable:$true] %s29_s22 }
   0x3   :  { %p2037_p1 = scmp.lt.u32.totalorder %s2033_s25, %s2453_s2 }
   0x5   :  { %p2039_p2 = pnand %p2037_p1, %p2034_p0 }
   0x7   :  { %2042 = shalt.err (!%p2039_p2)
}
   0x8   :  { %s2043_s30 = scalar_lea.vmem %s30_s22, 128  ;;  %p2048_p4 = scmp.lt.s32.totalorder %s30_s22, %s30_s22 }
   0x9   :  { %p2044_p3 = scmp.ne.s32.totalorder %s30_s22, %s2043_s30  ;;  %p2049_p5 = scmp.lt.s32.totalorder %s2043_s30, %s2043_s30 }
   0xb   :  { %p2050_p6 = por %p2049_p5, %p2048_p4 }
   0xd   :  { %p2051_p7 = pnand %p2050_p6, %p2044_p3 }
   0xf   :  { %2054 = shalt.err (!%p2051_p7)
}
  0x10   :  { %s2082_s13 = smov 64   ;;  %s2083_s14 = smov 4  }
  0x11   :  { %35 = dma.hbm_to_vmem [thread:$0]  %s2453_s2, 128, %s30_s22, [#allocation3], %s2082_s13, %s2082_s13, %s2083_s14  }
  0x12   :  { %s2084_s17 = smov [#allocation4]   ;;  %s2055_s21 = scalar_lea.hbm %s2458_s7, 256 }
  0x13   :  { %s49_s18 = sshll.u32 %s2084_s17, 4  ;;  %p2056_p8 = scmp.ne.s32.totalorder %s2458_s7, %s2055_s21  ;;  %s50_s18 = int_to_ptr.vmem [resolvable:$true] %s49_s18 }
  0x14   :  { %p2059_p9 = scmp.lt.u32.totalorder %s2055_s21, %s2458_s7 }
  0x16   :  { %p2061_p10 = pnand %p2059_p9, %p2056_p8 }
  0x18   :  { %2064 = shalt.err (!%p2061_p10)
}
  0x19   :  { %s2065_s27 = scalar_lea.vmem %s50_s18, 256  ;;  %p2070_p12 = scmp.lt.s32.totalorder %s50_s18, %s50_s18 }
  0x1a   :  { %p2066_p11 = scmp.ne.s32.totalorder %s50_s18, %s2065_s27  ;;  %p2071_p13 = scmp.lt.s32.totalorder %s2065_s27, %s2065_s27 }
  0x1c   :  { %p2072_p0 = por %p2071_p13, %p2070_p12 }
  0x1e   :  { %p2073_p1 = pnand %p2072_p0, %p2066_p11 }
  0x20   :  { %2076 = shalt.err (!%p2073_p1)
}
  0x21   :  { %55 = dma.hbm_to_vmem [thread:$0]  %s2458_s7, 256, %s50_s18, [#allocation5], %s2082_s13, %s2082_s13, %s2083_s14  }
  0x22   :  { %2077 = dma.done.wait [#allocation3], 128  }
  0x23   :  { %2078 = vsyncadd [#allocation3], 4294967168 }
  0x24   :  { %2079 = dma.done.wait [#allocation5], 256  }
  0x25   :  { %2080 = vsyncadd [#allocation5], 4294967040  ;;  %v1986_v0 = vld [vmem:[#allocation2] sm:$0xff]   ;;  %vm112_vm0 = vcmask 130048   ;;  %v1988_v2 = vld [vmem:[%s2451_s0 + $0x8] sm:$0xff]   ;;  %vm218_vm1 = vcmask 261120  }
  0x26   :  { %v1987_v1 = vld [vmem:[%s2451_s0] sm:$0xff]   ;;  %1814 = vmatprep.subr.bf16.mxu0 %v1986_v0  ;;  %v1989_v3 = vld [vmem:[%s2451_s0 + $0x10] sm:$0xff]   ;;  %v1990_v4 = vld [vmem:[%s2451_s0 + $0x18] sm:$0xff]   ;;  %v2085_v40 = vmov 0.0   ;;  %vm2086_vm2 = vmmov 0   ;;  %vm1014_vm3 = vcmask 1043456  }
  0x27   :  { %1815 = vmatpush3.bf16.msra.mxu0 %v1986_v0  ;;  %1816 = vmatprep.mubr.msk.bf16.mxu0 %vm112_vm0, %v1987_v1  ;;  %v1991_v5 = vld [vmem:[%s2455_s4] sm:$0xff]   ;;  %v1993_v7 = vld [vmem:[%s2455_s4 + $0x8] sm:$0xff]   ;;  %vm914_vm4 = vcmask 64512  }
  0x28   :  { %v1992_v6 = vld [vmem:[%s2456_s5] sm:$0xff]   ;;  %1824 = vmatprep.subr.bf16.mxu1 %v1991_v5  ;;  %v1994_v8 = vld [vmem:[%s2456_s5 + $0x8] sm:$0xff]  }
  0x29   :  { %1836 = vmatprep.subr.bf16.mxu0 %v1992_v6  ;;  %1825 = vmatpush3.bf16.msra.mxu1 %v1991_v5  ;;  %v1995_v9 = vld [vmem:[%s2457_s6] sm:$0xff]   ;;  %v1996_v28 = vld [vmem:[%s2457_s6 + $0x8] sm:$0xff]  }
  0x2a   :  { %1817 = vmatmul.mubr.msk.bf16.vlgmr.msra.gmra.mrb[0].mxu0 %vm112_vm0, %v1988_v2  ;;  %1826 = vmatprep.subr.bf16.mxu1 %v1993_v7  ;;  %v1622_v10 = vld [vmem:[%s2454_s3] ss:$0 sm:$0xff] }
  0x2b   :  { %1820 = vmatprep.mubr.msk.bf16.mxu0 %vm112_vm0, %v1989_v3  ;;  %1837 = vmatpush3.bf16.msra.mxu0 %v1992_v6 }
  0x2c   :  { %1838 = vmatprep.subr.bf16.mxu0 %v1994_v8 }
  0x2d   :  { %1827 = vmatpush3.bf16.msra.mxu1 %v1993_v7 }
  0x2e   :  { %1848 = vmatprep.subr.bf16.mxu1 %v1995_v9 }
  0x2f   :  { %1839 = vmatpush3.bf16.msra.mxu0 %v1994_v8 }
  0x30   :  { %1860 = vmatprep.subr.bf16.mxu0 %v2085_v40 }
  0x32   :  { %1821 = vmatmul.mubr.msk.bf16.gmra.mrb[4].mxu0 %vm112_vm0, %v1990_v4 }
  0xfd   :  { %v1818_v11 = vpop.f32.mrb[0].mxu0 }
  0xfe   :  { %v168_v12 = vadd.f32 %v1818_v11, %v1622_v10  ;;  %v159_v13 = vpop.f32.mrb[1].mxu0 }
  0xff   :  { %v160_v14 = vadd.f32 %v1622_v10, %v159_v13  ;;  %v1819_v15 = vpop.f32.mrb[2].mxu0 }
 0x100   :  { %v171_v16 = vadd.f32 %v1819_v15, %v1622_v10  ;;  %v162_v17 = vpop.f32.mrb[3].mxu0  ;;  %v192_v19 = vmax.f32 %v168_v12, 0.0 }
 0x101   :  { %v163_v18 = vadd.f32 %v1622_v10, %v162_v17  ;;  %v190_v21 = vmax.f32 %v160_v14, 0.0 }
 0x102   :  { %v193_v20 = vmax.f32 %v171_v16, 0.0 }
 0x103   :  { %v191_v22 = vmax.f32 %v163_v18, 0.0 }
 0x104   :  { %v199_v23 = vpack.c.bf16 %v193_v20, %v192_v19 }
 0x105   :  { %v198_v24 = vpack.c.bf16 %v191_v22, %v190_v21  ;;  %v1822_v25 = vpop.f32.mrb[4].mxu0 }
 0x106   :  { %v184_v26 = vadd.f32 %v1822_v25, %v1622_v10  ;;  %v175_v27 = vpop.f32.mrb[5].mxu0 }
 0x107   :  { %v176_v29 = vadd.f32 %v1622_v10, %v175_v27  ;;  %v1823_v30 = vpop.f32.mrb[6].mxu0  ;;  %1828 = vmatprep.mubr.msk.bf16.mxu1 %vm218_vm1, %v198_v24  ;;  %1840 = vmatprep.mubr.msk.bf16.mxu0 %vm218_vm1, %v198_v24 }
 0x108   :  { %v196_v31 = vmax.f32 %v184_v26, 0.0  ;;  %v187_v32 = vadd.f32 %v1823_v30, %v1622_v10  ;;  %v178_v33 = vpop.f32.mrb[7].mxu0  ;;  %1829 = vmatmul.mubr.msk.bf16.vlgmr.msra.gmra.mrb[0].mxu1 %vm218_vm1, %v199_v23  ;;  %1841 = vmatmul.mubr.msk.bf16.vlgmr.msra.gmra.mrb[8].mxu0 %vm218_vm1, %v199_v23 }
 0x109   :  { %v194_v34 = vmax.f32 %v176_v29, 0.0  ;;  %v179_v35 = vadd.f32 %v1622_v10, %v178_v33  ;;  %1849 = vmatpush3.bf16.msra.mxu1 %v1995_v9 }
 0x10a   :  { %v197_v36 = vmax.f32 %v187_v32, 0.0  ;;  %1850 = vmatprep.subr.bf16.mxu1 %v1996_v28 }
 0x10b   :  { %v195_v37 = vmax.f32 %v179_v35, 0.0 }
 0x10c   :  { %v201_v38 = vpack.c.bf16 %v197_v36, %v196_v31 }
 0x10d   :  { %v200_v39 = vpack.c.bf16 %v195_v37, %v194_v34  ;;  %1851 = vmatpush3.bf16.msra.mxu1 %v1996_v28 }
 0x10e   :  { %1866 = vmatprep.subr.bf16.mxu1 %v2085_v40 }
 0x10f   :  { %1832 = vmatprep.mubr.msk.bf16.mxu1 %vm218_vm1, %v200_v39  ;;  %1844 = vmatprep.mubr.msk.bf16.mxu0 %vm218_vm1, %v200_v39 }
 0x110   :  { %1833 = vmatmul.mubr.msk.bf16.gmra.mrb[4].mxu1 %vm218_vm1, %v201_v38  ;;  %1845 = vmatmul.mubr.msk.bf16.gmra.mrb[12].mxu0 %vm218_vm1, %v201_v38 }
 0x111   :  { %1852 = vmatprep.mubr.msk.bf16.mxu1 %vm218_vm1, %v198_v24  ;;  %1862 = vmatprep.mubr.msk.bf16.mxu0 %vm2086_vm2, %v2085_v40 }
 0x118   :  { %1853 = vmatmul.mubr.msk.bf16.vlgmr.msra.gmra.mrb[8].mxu1 %vm218_vm1, %v199_v23 }
 0x119   :  { %1856 = vmatprep.mubr.msk.bf16.mxu1 %vm218_vm1, %v200_v39 }
 0x120   :  { %1857 = vmatmul.mubr.msk.bf16.gmra.mrb[12].mxu1 %vm218_vm1, %v201_v38 }
 0x121   :  { %1868 = vmatprep.mubr.msk.bf16.mxu1 %vm2086_vm2, %v2085_v40 }
 0x1db   :  { %v1830_v41 = vpop.f32.mrb[0].mxu1  ;;  %v1842_v42 = vpop.f32.mrb[8].mxu0 }
 0x1dc   :  { %v265_v43 = vpop.f32.mrb[1].mxu1  ;;  %v346_v44 = vpop.f32.mrb[9].mxu0  ;;  %v1714_v53 = vpack.c.bf16 %v1842_v42, %v1842_v42  ;;  %v1706_v7 = vpack.c.bf16 %v1830_v41, %v1830_v41  ;;  %v1729_v42 = vld [vmem:[%s2452_s1] sm:$0xff]  }
 0x1dd   :  { %v1712_v45 = vpack.c.bf16 %v346_v44, %v346_v44  ;;  %v1831_v46 = vpop.f32.mrb[2].mxu1  ;;  %v1843_v47 = vpop.f32.mrb[10].mxu0  ;;  %v1704_v58 = vpack.c.bf16 %v265_v43, %v265_v43  ;;  %v1730_v43 = vunpack.c.l.bf16 %v1729_v42  ;;  %v1731_v44 = vunpack.c.h.bf16 %v1729_v42 }
 0x1de   :  { %v268_v48 = vpop.f32.mrb[3].mxu1  ;;  %v349_v49 = vpop.f32.mrb[11].mxu0  ;;  %v1715_v59 = vpack.c.bf16 %v1843_v47, %v1843_v47  ;;  %v642_v0 = vsel %vm218_vm1, %v1714_v53, 0  ;;  %v1707_v13 = vpack.c.bf16 %v1831_v46, %v1831_v46 }
 0x1df   :  { %v550_v50 = vsel %vm218_vm1, %v1712_v45, 0  ;;  %v1713_v51 = vpack.c.bf16 %v349_v49, %v349_v49  ;;  %v1705_v1 = vpack.c.bf16 %v268_v48, %v268_v48 }
 0x1e0   :  { %1861 = vmatpush3.bf16.xpose.msra.mxu0 %v550_v50  ;;  %v688_v2 = vsel %vm218_vm1, %v1715_v59, 0  ;;  %v1744_v50 = vld [vmem:[%s2452_s1 + $0x8] sm:$0xff]  }
 0x1e1   :  { %v596_v52 = vsel %vm218_vm1, %v1713_v51, 0  ;;  %1872 = vmatprep.subr.bf16.mxu0 %v2085_v40  ;;  %v1735_v59 = vunpack.c.h.bf16 %v1744_v50 }
 0x1e2   :  { %1867 = vmatpush3.bf16.xpose.msra.mxu1 %v596_v52 }
 0x1e3   :  { %v2230_v54 = vpop.f32.mrb[4].mxu1  ;;  %1878 = vmatprep.subr.bf16.mxu1 %v2085_v40  ;;  %v1846_v55 = vpop.f32.mrb[12].mxu0 }
 0x1e4   :  { %v281_v56 = vpop.f32.mrb[5].mxu1  ;;  %v362_v57 = vpop.f32.mrb[13].mxu0  ;;  %v1718_v17 = vpack.c.bf16 %v1846_v55, %v1846_v55  ;;  %v1710_v36 = vpack.c.bf16 %v2230_v54, %v2230_v54 }
 0x1e5   :  { %v2233_v60 = vpop.f32.mrb[6].mxu1  ;;  %v1847_v61 = vpop.f32.mrb[14].mxu0  ;;  %v1716_v4 = vpack.c.bf16 %v362_v57, %v362_v57  ;;  %v1708_v21 = vpack.c.bf16 %v281_v56, %v281_v56  ;;  %v1734_v57 = vunpack.c.l.bf16 %v1744_v50 }
 0x1e6   :  { %v284_v62 = vpop.f32.mrb[7].mxu1  ;;  %v365_v63 = vpop.f32.mrb[15].mxu0  ;;  %v1719_v22 = vpack.c.bf16 %v1847_v61, %v1847_v61  ;;  %v826_v29 = vsel %vm218_vm1, %v1718_v17, 0  ;;  %v1711_v38 = vpack.c.bf16 %v2233_v60, %v2233_v60 }
 0x1e7   :  { %1863 = vmatmul.mubr.msk.bf16.vlgmr.msra.gmra.mrb[16].mxu0 %vm218_vm1, %v1704_v58  ;;  %v1717_v9 = vpack.c.bf16 %v365_v63, %v365_v63  ;;  %v734_v14 = vsel %vm218_vm1, %v1716_v4, 0  ;;  %v1709_v28 = vpack.c.bf16 %v284_v62, %v284_v62 }
 0x1e8   :  { %1873 = vmatpush3.bf16.xpose.msra.mxu0 %v642_v0  ;;  %1874 = vmatprep.mubr.msk.bf16.mxu0 %vm2086_vm2, %v2085_v40  ;;  %v872_v33 = vsel %vm218_vm1, %v1719_v22, 0 }
 0x1e9   :  { %1869 = vmatmul.mubr.msk.bf16.vlgmr.msra.gmra.mrb[16].mxu1 %vm218_vm1, %v1705_v1  ;;  %1884 = vmatprep.subr.bf16.mxu0 %v2085_v40  ;;  %v780_v16 = vsel %vm218_vm1, %v1717_v9, 0  ;;  %v1745_v1 = vld [vmem:[%s2452_s1 + $0x10] sm:$0xff]  }
 0x1ea   :  { %1879 = vmatpush3.bf16.xpose.msra.mxu1 %v688_v2  ;;  %1880 = vmatprep.mubr.msk.bf16.mxu1 %vm2086_vm2, %v2085_v40 }
 0x1eb   :  { %v1854_v3 = vpop.f32.mrb[8].mxu1  ;;  %1890 = vmatprep.subr.bf16.mxu1 %v2085_v40 }
 0x1ec   :  { %v1722_v5 = vpack.c.bf16 %v1854_v3, %v1854_v3  ;;  %v427_v6 = vpop.f32.mrb[9].mxu1 }
 0x1ed   :  { %v1855_v8 = vpop.f32.mrb[10].mxu1  ;;  %v1720_v35 = vpack.c.bf16 %v427_v6, %v427_v6 }
 0x1ee   :  { %v2246_v10 = vsel %vm1014_vm3, %v1722_v5, 0  ;;  %v1723_v11 = vpack.c.bf16 %v1855_v8, %v1855_v8  ;;  %v430_v12 = vpop.f32.mrb[11].mxu1  ;;  %v1738_v8 = vunpack.c.l.bf16 %v1745_v1 }
 0x1ef   :  { %1875 = vmatmul.mubr.msk.bf16.vlgmr.msra.gmra.mrb[20].mxu0 %vm218_vm1, %v1706_v7  ;;  %v1721_v37 = vpack.c.bf16 %v430_v12, %v430_v12  ;;  %v1016_v39 = vsel %vm1014_vm3, %v1720_v35, 0 }
 0x1f0   :  { %v2251_v15 = vsel %vm1014_vm3, %v1723_v11, 0  ;;  %1885 = vmatpush3.bf16.xpose.msra.mxu0 %v734_v14  ;;  %1886 = vmatprep.mubr.msk.bf16.mxu0 %vm2086_vm2, %v2085_v40  ;;  %v1739_v11 = vunpack.c.h.bf16 %v1745_v1 }
 0x1f1   :  { %1881 = vmatmul.mubr.msk.bf16.vlgmr.msra.gmra.mrb[20].mxu1 %vm218_vm1, %v1707_v13  ;;  %1896 = vmatprep.subr.bf16.mxu0 %v2085_v40  ;;  %v1062_v41 = vsel %vm1014_vm3, %v1721_v37, 0 }
 0x1f2   :  { %1891 = vmatpush3.bf16.xpose.msra.mxu1 %v780_v16  ;;  %1892 = vmatprep.mubr.msk.bf16.mxu1 %vm2086_vm2, %v2085_v40 }
 0x1f3   :  { %v1858_v18 = vpop.f32.mrb[12].mxu1  ;;  %1902 = vmatprep.subr.bf16.mxu1 %v2085_v40 }
 0x1f4   :  { %v1726_v19 = vpack.c.bf16 %v1858_v18, %v1858_v18  ;;  %v443_v20 = vpop.f32.mrb[13].mxu1  ;;  %v1746_v18 = vld [vmem:[%s2452_s1 + $0x18] sm:$0xff]  }
 0x1f5   :  { %v1724_v23 = vpack.c.bf16 %v443_v20, %v443_v20  ;;  %v1859_v24 = vpop.f32.mrb[14].mxu1 }
 0x1f6   :  { %v2262_v25 = vsel %vm1014_vm3, %v1726_v19, 0  ;;  %v1727_v26 = vpack.c.bf16 %v1859_v24, %v1859_v24  ;;  %v446_v27 = vpop.f32.mrb[15].mxu1 }
 0x1f7   :  { %v2266_v30 = vsel %vm1014_vm3, %v1724_v23, 0  ;;  %v1725_v31 = vpack.c.bf16 %v446_v27, %v446_v27  ;;  %1887 = vmatmul.mubr.msk.bf16.vlgmr.msra.gmra.mrb[24].mxu0 %vm218_vm1, %v1708_v21  ;;  %v1742_v27 = vunpack.c.l.bf16 %v1746_v18 }
 0x1f8   :  { %v2270_v32 = vsel %vm1014_vm3, %v1727_v26, 0  ;;  %1897 = vmatpush3.bf16.xpose.msra.mxu0 %v826_v29  ;;  %1898 = vmatprep.mubr.msk.bf16.mxu0 %vm2086_vm2, %v2085_v40 }
 0x1f9   :  { %v2276_v34 = vsel %vm1014_vm3, %v1725_v31, 0  ;;  %1893 = vmatmul.mubr.msk.bf16.vlgmr.msra.gmra.mrb[24].mxu1 %vm218_vm1, %v1709_v28  ;;  %1908 = vmatprep.subr.bf16.mxu0 %v2085_v40  ;;  %v1743_v28 = vunpack.c.h.bf16 %v1746_v18 }
 0x1fa   :  { %1903 = vmatpush3.bf16.xpose.msra.mxu1 %v872_v33  ;;  %1904 = vmatprep.mubr.msk.bf16.mxu1 %vm2086_vm2, %v2085_v40 }
 0x1fb   :  { %1914 = vmatprep.subr.bf16.mxu1 %v2085_v40 }
 0x1ff   :  { %1899 = vmatmul.mubr.msk.bf16.vlgmr.msra.gmra.mrb[28].mxu0 %vm218_vm1, %v1710_v36 }
 0x200   :  { %1909 = vmatpush3.bf16.msra.mxu0 %v1016_v39  ;;  %1910 = vmatprep.mubr.msk.bf16.mxu0 %vm2086_vm2, %v2085_v40 }
 0x201   :  { %1905 = vmatmul.mubr.msk.bf16.vlgmr.msra.gmra.mrb[28].mxu1 %vm218_vm1, %v1711_v38  ;;  %1920 = vmatprep.subr.bf16.mxu0 %v2085_v40 }
 0x202   :  { %1915 = vmatpush3.bf16.msra.mxu1 %v1062_v41  ;;  %1916 = vmatprep.mubr.msk.bf16.mxu1 %vm2086_vm2, %v2085_v40 }
 0x203   :  { %1926 = vmatprep.subr.bf16.mxu1 %v2085_v40 }
 0x2ba   :  { %v586_v45 = vpop.f32.mrb[16].mxu0 }
 0x2bb   :  { %v2300_v46 = vadd.f32 %v1730_v43, %v586_v45  ;;  %v1864_v47 = vpop.f32.mrb[17].mxu0 }
 0x2bc   :  { %v589_v48 = vpop.f32.mrb[18].mxu0  ;;  %v632_v49 = vpop.f32.mrb[16].mxu1 }
 0x2bd   :  { %v2305_v51 = vadd.f32 %v1731_v44, %v632_v49  ;;  %v1865_v52 = vpop.f32.mrb[19].mxu0  ;;  %v1870_v53 = vpop.f32.mrb[17].mxu1  ;;  %v915_v54 = vsel %vm914_vm4, %v2300_v46, -inf }
 0x2be   :  { %916 = vmax.xlane.f32.xlu0 %v915_v54  ;;  %v635_v55 = vpop.f32.mrb[18].mxu1 }
 0x2bf   :  { %v1871_v56 = vpop.f32.mrb[19].mxu1  ;;  %v918_v58 = vsel %vm914_vm4, %v2305_v51, -inf }
 0x2c2   :  { %v678_v60 = vpop.f32.mrb[20].mxu0  ;;  %919 = vmax.xlane.f32.xlu0 %v918_v58 }
 0x2c3   :  { %v679_v61 = vadd.f32 %v1734_v57, %v678_v60  ;;  %v1876_v62 = vpop.f32.mrb[21].mxu0 }
 0x2c4   :  { %v681_v63 = vpop.f32.mrb[22].mxu0  ;;  %v724_v0 = vpop.f32.mrb[20].mxu1 }
 0x2c5   :  { %v725_v2 = vadd.f32 %v1735_v59, %v724_v0  ;;  %v1877_v3 = vpop.f32.mrb[23].mxu0  ;;  %v1882_v4 = vpop.f32.mrb[21].mxu1  ;;  %v921_v5 = vsel %vm914_vm4, %v679_v61, -inf }
 0x2c6   :  { %922 = vmax.xlane.f32.xlu1 %v921_v5  ;;  %v727_v6 = vpop.f32.mrb[22].mxu1 }
 0x2c7   :  { %v1883_v7 = vpop.f32.mrb[23].mxu1  ;;  %v924_v9 = vsel %vm914_vm4, %v725_v2, -inf }
 0x2ca   :  { %v770_v12 = vpop.f32.mrb[24].mxu0  ;;  %925 = vmax.xlane.f32.xlu1 %v924_v9 }
 0x2cb   :  { %v771_v13 = vadd.f32 %v1738_v8, %v770_v12  ;;  %v1888_v14 = vpop.f32.mrb[25].mxu0 }
 0x2cc   :  { %v773_v16 = vpop.f32.mrb[26].mxu0  ;;  %v816_v17 = vpop.f32.mrb[24].mxu1 }
 0x2cd   :  { %v817_v19 = vadd.f32 %v1739_v11, %v816_v17  ;;  %v1889_v20 = vpop.f32.mrb[27].mxu0  ;;  %v1894_v21 = vpop.f32.mrb[25].mxu1  ;;  %v927_v22 = vsel %vm914_vm4, %v771_v13, -inf }
 0x2ce   :  { %928 = vmax.xlane.f32.xlu0 %v927_v22  ;;  %v819_v23 = vpop.f32.mrb[26].mxu1 }
 0x2cf   :  { %v1895_v24 = vpop.f32.mrb[27].mxu1  ;;  %v930_v26 = vsel %vm914_vm4, %v817_v19, -inf }
 0x2d0   :  { %931 = vmax.xlane.f32.xlu1 %v930_v26 }
 0x2d2   :  { %v862_v29 = vpop.f32.mrb[28].mxu0 }
 0x2d3   :  { %v863_v31 = vadd.f32 %v1742_v27, %v862_v29  ;;  %v1900_v33 = vpop.f32.mrb[29].mxu0 }
 0x2d4   :  { %v865_v35 = vpop.f32.mrb[30].mxu0  ;;  %v908_v36 = vpop.f32.mrb[28].mxu1 }
 0x2d5   :  { %v909_v37 = vadd.f32 %v1743_v28, %v908_v36  ;;  %v1901_v38 = vpop.f32.mrb[31].mxu0  ;;  %v1906_v39 = vpop.f32.mrb[29].mxu1  ;;  %v933_v41 = vsel %vm914_vm4, %v863_v31, -inf }
 0x2d6   :  { %934 = vmax.xlane.f32.xlu0 %v933_v41  ;;  %v911_v42 = vpop.f32.mrb[30].mxu1 }
 0x2d7   :  { %v1907_v43 = vpop.f32.mrb[31].mxu1  ;;  %v936_v44 = vsel %vm914_vm4, %v909_v37, -inf }
 0x2d8   :  { %937 = vmax.xlane.f32.xlu1 %v936_v44 }
 0x34b   :  { %v917_v45 = vpop.xlane.xlu0 %916 }
 0x34c   :  { %v939_v47 = vsub.f32 %v2300_v46, %v917_v45 }
 0x34e   :  { %v947_v48 = vmul.f32 1.442695, %v939_v47 }
 0x34f   :  { %v920_v49 = vpop.xlane.xlu0 %919 }
 0x350   :  { %2001 = vpow2.f32 %v947_v48  ;;  %v940_v50 = vsub.f32 %v2305_v51, %v920_v49 }
 0x352   :  { %v949_v52 = vmul.f32 1.442695, %v940_v50 }
 0x353   :  { %v923_v53 = vpop.xlane.xlu1 %922 }
 0x354   :  { %2003 = vpow2.f32 %v949_v52  ;;  %v941_v54 = vsub.f32 %v679_v61, %v923_v53 }
 0x356   :  { %v951_v55 = vmul.f32 1.442695, %v941_v54 }
 0x357   :  { %v926_v56 = vpop.xlane.xlu1 %925 }
 0x358   :  { %2005 = vpow2.f32 %v951_v55  ;;  %v942_v57 = vsub.f32 %v725_v2, %v926_v56 }
 0x35a   :  { %v2002_v58 = vpop.eup %2001  ;;  %v953_v59 = vmul.f32 1.442695, %v942_v57  ;;  %v1997_v57 = vld [vmem:[#allocation4] sm:$0xff]  }
 0x35b   :  { %v929_v60 = vpop.xlane.xlu0 %928  ;;  %v963_v62 = vsel %vm914_vm4, %v2002_v58, 0.0 }
 0x35c   :  { %2007 = vpow2.f32 %v953_v59  ;;  %v943_v46 = vsub.f32 %v771_v13, %v929_v60  ;;  %964 = vadd.xlane.f32.xlu0 %v963_v62 }
 0x35d   :  { %v932_v63 = vpop.xlane.xlu1 %931 }
 0x35e   :  { %v2004_v0 = vpop.eup %2003  ;;  %v955_v1 = vmul.f32 1.442695, %v943_v46  ;;  %v944_v51 = vsub.f32 %v817_v19, %v932_v63 }
 0x35f   :  { %v966_v3 = vsel %vm914_vm4, %v2004_v0, 0.0 }
 0x360   :  { %2009 = vpow2.f32 %v955_v1  ;;  %v957_v61 = vmul.f32 1.442695, %v944_v51  ;;  %967 = vadd.xlane.f32.xlu1 %v966_v3 }
 0x362   :  { %v2006_v4 = vpop.eup %2005  ;;  %2011 = vpow2.f32 %v957_v61 }
 0x363   :  { %v935_v2 = vpop.xlane.xlu0 %934  ;;  %v969_v5 = vsel %vm914_vm4, %v2006_v4, 0.0 }
 0x364   :  { %v945_v6 = vsub.f32 %v863_v31, %v935_v2  ;;  %970 = vadd.xlane.f32.xlu0 %v969_v5 }
 0x365   :  { %v938_v7 = vpop.xlane.xlu1 %937 }
 0x366   :  { %v2008_v8 = vpop.eup %2007  ;;  %v959_v9 = vmul.f32 1.442695, %v945_v6  ;;  %v946_v11 = vsub.f32 %v909_v37, %v938_v7 }
 0x367   :  { %v972_v12 = vsel %vm914_vm4, %v2008_v8, 0.0 }
 0x368   :  { %2013 = vpow2.f32 %v959_v9  ;;  %v961_v13 = vmul.f32 1.442695, %v946_v11  ;;  %973 = vadd.xlane.f32.xlu1 %v972_v12 }
 0x36a   :  { %v2010_v14 = vpop.eup %2009  ;;  %2015 = vpow2.f32 %v961_v13 }
 0x36b   :  { %v975_v16 = vsel %vm914_vm4, %v2010_v14, 0.0 }
 0x36c   :  { %v2012_v17 = vpop.eup %2011  ;;  %976 = vadd.xlane.f32.xlu0 %v975_v16 }
 0x36d   :  { %v978_v18 = vsel %vm914_vm4, %v2012_v17, 0.0 }
 0x36e   :  { %979 = vadd.xlane.f32.xlu1 %v978_v18 }
 0x372   :  { %v2014_v19 = vpop.eup %2013 }
 0x373   :  { %v981_v20 = vsel %vm914_vm4, %v2014_v19, 0.0 }
 0x374   :  { %v2332_v21 = vpop.eup %2015  ;;  %982 = vadd.xlane.f32.xlu0 %v981_v20 }
 0x375   :  { %v984_v22 = vsel %vm914_vm4, %v2332_v21, 0.0 }
 0x376   :  { %985 = vadd.xlane.f32.xlu1 %v984_v22 }
 0x3e9   :  { %v965_v23 = vpop.xlane.xlu0 %964 }
 0x3ea   :  { %2017 = vrcp.f32 %v965_v23 }
 0x3ed   :  { %v968_v24 = vpop.xlane.xlu1 %967 }
 0x3ee   :  { %2019 = vrcp.f32 %v968_v24 }
 0x3f1   :  { %v971_v26 = vpop.xlane.xlu0 %970 }
 0x3f2   :  { %2021 = vrcp.f32 %v971_v26 }
 0x3f4   :  { %v2018_v27 = vpop.eup %2017 }
 0x3f5   :  { %v995_v28 = vmul.f32 %v2018_v27, %v2002_v58  ;;  %v974_v29 = vpop.xlane.xlu1 %973  ;;  %v1998_v58 = vld [vmem:[#allocation4 + $0x8] sm:$0xff]  }
 0x3f6   :  { %2023 = vrcp.f32 %v974_v29 }
 0x3f7   :  { %v1003_v31 = vpack.c.bf16 %v995_v28, %v995_v28 }
 0x3f8   :  { %v2020_v33 = vpop.eup %2019 }
 0x3f9   :  { %v996_v35 = vmul.f32 %v2020_v33, %v2004_v0  ;;  %1911 = vmatmul.mubr.msk.bf16.vlgmr.msra.gmra.mrb[32].mxu0 %vm914_vm4, %v1003_v31  ;;  %v977_v36 = vpop.xlane.xlu0 %976  ;;  %v1999_v31 = vld [vmem:[%s2460_s9] sm:$0xff]   ;;  %v2000_v33 = vld [vmem:[%s2460_s9 + $0x8] sm:$0xff]  }
 0x3fa   :  { %1921 = vmatpush3.bf16.msra.mxu0 %v2246_v10  ;;  %2025 = vrcp.f32 %v977_v36  ;;  %1922 = vmatprep.mubr.msk.bf16.mxu0 %vm2086_vm2, %v2085_v40 }
 0x3fb   :  { %v980_v37 = vpop.xlane.xlu1 %979  ;;  %v1004_v38 = vpack.c.bf16 %v996_v35, %v996_v35  ;;  %1932 = vmatprep.subr.bf16.mxu0 %v2085_v40  ;;  %v1690_v35 = vld [vmem:[%s2459_s8] ss:$0 sm:$0xff] }
 0x3fc   :  { %v2022_v39 = vpop.eup %2021  ;;  %2027 = vrcp.f32 %v980_v37 }
 0x3fd   :  { %v997_v41 = vmul.f32 %v2022_v39, %v2006_v4  ;;  %1917 = vmatmul.mubr.msk.bf16.vlgmr.msra.gmra.mrb[32].mxu1 %vm914_vm4, %v1004_v38 }
 0x3fe   :  { %1927 = vmatpush3.bf16.msra.mxu1 %v2251_v15  ;;  %1928 = vmatprep.mubr.msk.bf16.mxu1 %vm2086_vm2, %v2085_v40 }
 0x3ff   :  { %v1005_v42 = vpack.c.bf16 %v997_v41, %v997_v41  ;;  %1938 = vmatprep.subr.bf16.mxu1 %v2085_v40 }
 0x400   :  { %v2024_v10 = vpop.eup %2023 }
 0x401   :  { %v998_v43 = vmul.f32 %v2024_v10, %v2008_v8  ;;  %1923 = vmatmul.mubr.msk.bf16.vlgmr.msra.gmra.mrb[36].mxu0 %vm914_vm4, %v1005_v42  ;;  %v983_v44 = vpop.xlane.xlu0 %982 }
 0x402   :  { %1933 = vmatpush3.bf16.msra.mxu0 %v2266_v30  ;;  %2029 = vrcp.f32 %v983_v44  ;;  %1934 = vmatprep.mubr.msk.bf16.mxu0 %vm2086_vm2, %v2085_v40 }
 0x403   :  { %v986_v45 = vpop.xlane.xlu1 %985  ;;  %v1006_v47 = vpack.c.bf16 %v998_v43, %v998_v43  ;;  %1944 = vmatprep.subr.bf16.mxu0 %v2085_v40 }
 0x404   :  { %v2026_v15 = vpop.eup %2025  ;;  %2031 = vrcp.f32 %v986_v45 }
 0x405   :  { %v999_v48 = vmul.f32 %v2026_v15, %v2010_v14  ;;  %1929 = vmatmul.mubr.msk.bf16.vlgmr.msra.gmra.mrb[36].mxu1 %vm914_vm4, %v1006_v47 }
 0x406   :  { %v2028_v49 = vpop.eup %2027  ;;  %1939 = vmatpush3.bf16.msra.mxu1 %v2276_v34  ;;  %1940 = vmatprep.mubr.msk.bf16.mxu1 %vm2086_vm2, %v2085_v40 }
 0x407   :  { %v1000_v30 = vmul.f32 %v2028_v49, %v2012_v17  ;;  %v1007_v50 = vpack.c.bf16 %v999_v48, %v999_v48  ;;  %1950 = vmatprep.subr.bf16.mxu1 %v2085_v40 }
 0x409   :  { %1935 = vmatmul.mubr.msk.bf16.vlgmr.msra.gmra.mrb[40].mxu0 %vm914_vm4, %v1007_v50  ;;  %v1008_v52 = vpack.c.bf16 %v1000_v30, %v1000_v30 }
 0x40a   :  { %1945 = vmatpush3.bf16.msra.mxu0 %v2262_v25  ;;  %1946 = vmatprep.mubr.msk.bf16.mxu0 %vm2086_vm2, %v2085_v40 }
 0x40b   :  { %1956 = vmatprep.subr.bf16.mxu0 %v1997_v57 }
 0x40c   :  { %v2030_v53 = vpop.eup %2029 }
 0x40d   :  { %v1001_v54 = vmul.f32 %v2030_v53, %v2014_v19  ;;  %1941 = vmatmul.mubr.msk.bf16.vlgmr.msra.gmra.mrb[40].mxu1 %vm914_vm4, %v1008_v52 }
 0x40e   :  { %v2032_v34 = vpop.eup %2031  ;;  %1951 = vmatpush3.bf16.msra.mxu1 %v2270_v32  ;;  %1952 = vmatprep.mubr.msk.bf16.mxu1 %vm2086_vm2, %v2085_v40 }
 0x40f   :  { %v1009_v55 = vpack.c.bf16 %v1001_v54, %v1001_v54  ;;  %v1002_v56 = vmul.f32 %v2032_v34, %v2332_v21  ;;  %1968 = vmatprep.subr.bf16.mxu1 %v1999_v31 }
 0x411   :  { %1947 = vmatmul.mubr.msk.bf16.vlgmr.msra.gmra.mrb[44].mxu0 %vm914_vm4, %v1009_v55  ;;  %v1010_v25 = vpack.c.bf16 %v1002_v56, %v1002_v56 }
 0x412   :  { %1957 = vmatpush3.bf16.msra.mxu0 %v1997_v57 }
 0x413   :  { %1958 = vmatprep.subr.bf16.mxu0 %v1998_v58 }
 0x415   :  { %1953 = vmatmul.mubr.msk.bf16.vlgmr.msra.gmra.mrb[44].mxu1 %vm914_vm4, %v1010_v25 }
 0x416   :  { %1959 = vmatpush3.bf16.msra.mxu0 %v1998_v58  ;;  %1969 = vmatpush3.bf16.msra.mxu1 %v1999_v31 }
 0x417   :  { %1970 = vmatprep.subr.bf16.mxu1 %v2000_v33 }
 0x41a   :  { %1971 = vmatpush3.bf16.msra.mxu1 %v2000_v33 }
 0x4cc   :  { %v1052_v59 = vpop.f32.mrb[32].mxu0 }
 0x4cd   :  { %v1912_v60 = vpop.f32.mrb[33].mxu0 }
 0x4ce   :  { %v1055_v32 = vpop.f32.mrb[34].mxu0 }
 0x4cf   :  { %v1913_v62 = vpop.f32.mrb[35].mxu0 }
 0x4d0   :  { %v1098_v46 = vpop.f32.mrb[32].mxu1  ;;  %v1697_v62 = vld [vmem:[%s2461_s10] ss:$0 sm:$0xff] }
 0x4d1   :  { %v1380_v40 = vpack.c.bf16 %v1098_v46, %v1052_v59  ;;  %v1918_v63 = vpop.f32.mrb[33].mxu1 }
 0x4d2   :  { %v1101_v0 = vpop.f32.mrb[34].mxu1 }
 0x4d3   :  { %v1919_v1 = vpop.f32.mrb[35].mxu1  ;;  %1960 = vmatprep.mubr.msk.bf16.mxu0 %vm218_vm1, %v1380_v40 }
 0x4d4   :  { %v1144_v51 = vpop.f32.mrb[36].mxu0 }
 0x4d5   :  { %v1924_v3 = vpop.f32.mrb[37].mxu0 }
 0x4d6   :  { %v1147_v61 = vpop.f32.mrb[38].mxu0 }
 0x4d7   :  { %v1925_v4 = vpop.f32.mrb[39].mxu0 }
 0x4d8   :  { %v1190_v2 = vpop.f32.mrb[36].mxu1 }
 0x4d9   :  { %v1381_v5 = vpack.c.bf16 %v1190_v2, %v1144_v51  ;;  %v1930_v6 = vpop.f32.mrb[37].mxu1 }
 0x4da   :  { %v1193_v7 = vpop.f32.mrb[38].mxu1 }
 0x4db   :  { %v1931_v8 = vpop.f32.mrb[39].mxu1  ;;  %1961 = vmatmul.mubr.msk.bf16.vlgmr.msra.gmra.mrb[48].mxu0 %vm218_vm1, %v1381_v5 }
 0x4dc   :  { %v1236_v9 = vpop.f32.mrb[40].mxu0 }
 0x4dd   :  { %v1936_v11 = vpop.f32.mrb[41].mxu0 }
 0x4de   :  { %v1239_v12 = vpop.f32.mrb[42].mxu0 }
 0x4df   :  { %v1937_v13 = vpop.f32.mrb[43].mxu0 }
 0x4e0   :  { %v1282_v14 = vpop.f32.mrb[40].mxu1 }
 0x4e1   :  { %v1382_v16 = vpack.c.bf16 %v1282_v14, %v1236_v9  ;;  %v1942_v17 = vpop.f32.mrb[41].mxu1 }
 0x4e2   :  { %v1285_v18 = vpop.f32.mrb[42].mxu1 }
 0x4e3   :  { %v1943_v19 = vpop.f32.mrb[43].mxu1  ;;  %1964 = vmatprep.mubr.msk.bf16.mxu0 %vm218_vm1, %v1382_v16 }
 0x4e4   :  { %v1328_v20 = vpop.f32.mrb[44].mxu0 }
 0x4e5   :  { %v1948_v21 = vpop.f32.mrb[45].mxu0 }
 0x4e6   :  { %v1331_v22 = vpop.f32.mrb[46].mxu0 }
 0x4e7   :  { %v1949_v23 = vpop.f32.mrb[47].mxu0 }
 0x4e8   :  { %v1374_v24 = vpop.f32.mrb[44].mxu1 }
 0x4e9   :  { %v1383_v26 = vpack.c.bf16 %v1374_v24, %v1328_v20  ;;  %v1954_v27 = vpop.f32.mrb[45].mxu1 }
 0x4ea   :  { %v1377_v28 = vpop.f32.mrb[46].mxu1 }
 0x4eb   :  { %v1955_v29 = vpop.f32.mrb[47].mxu1  ;;  %1965 = vmatmul.mubr.msk.bf16.gmra.mrb[52].mxu0 %vm218_vm1, %v1383_v26 }
 0x5ae   :  { %v1962_v36 = vpop.f32.mrb[48].mxu0 }
 0x5af   :  { %v1462_v37 = vadd.f32 %v1962_v36, %v1690_v35  ;;  %v1453_v38 = vpop.f32.mrb[49].mxu0 }
 0x5b0   :  { %v1454_v39 = vadd.f32 %v1690_v35, %v1453_v38  ;;  %v1963_v41 = vpop.f32.mrb[50].mxu0 }
 0x5b1   :  { %v1486_v42 = vmax.f32 %v1462_v37, 0.0  ;;  %v1465_v10 = vadd.f32 %v1963_v41, %v1690_v35  ;;  %v1456_v43 = vpop.f32.mrb[51].mxu0 }
 0x5b2   :  { %v1484_v44 = vmax.f32 %v1454_v39, 0.0  ;;  %v1457_v45 = vadd.f32 %v1690_v35, %v1456_v43 }
 0x5b3   :  { %1606 = vst.msk [vmem:[%s2463_s12 + $0x10] sm:$0xff] %vm218_vm1, %v1486_v42  ;;  %v1487_v47 = vmax.f32 %v1465_v10, 0.0 }
 0x5b4   :  { %1604 = vst.msk [vmem:[%s2463_s12] sm:$0xff] %vm218_vm1, %v1484_v44  ;;  %v1485_v15 = vmax.f32 %v1457_v45, 0.0 }
 0x5b5   :  { %v1493_v48 = vpack.c.bf16 %v1487_v47, %v1486_v42  ;;  %1607 = vst.msk [vmem:[%s2463_s12 + $0x18] sm:$0xff] %vm218_vm1, %v1487_v47 }
 0x5b6   :  { %v1492_v49 = vpack.c.bf16 %v1485_v15, %v1484_v44  ;;  %1605 = vst.msk [vmem:[%s2463_s12 + $0x8] sm:$0xff] %vm218_vm1, %v1485_v15 }
 0x5b8   :  { %1972 = vmatprep.mubr.msk.bf16.mxu1 %vm218_vm1, %v1492_v49 }
 0x5b9   :  { %1973 = vmatmul.mubr.msk.bf16.vlgmr.msra.gmra.mrb[48].mxu1 %vm218_vm1, %v1493_v48 }
 0x5be   :  { %v1966_v30 = vpop.f32.mrb[52].mxu0 }
 0x5bf   :  { %v1478_v50 = vadd.f32 %v1966_v30, %v1690_v35  ;;  %v1469_v52 = vpop.f32.mrb[53].mxu0 }
 0x5c0   :  { %v1470_v53 = vadd.f32 %v1690_v35, %v1469_v52  ;;  %v1967_v54 = vpop.f32.mrb[54].mxu0 }
 0x5c1   :  { %v1490_v34 = vmax.f32 %v1478_v50, 0.0  ;;  %v1481_v55 = vadd.f32 %v1967_v54, %v1690_v35  ;;  %v1472_v56 = vpop.f32.mrb[55].mxu0 }
 0x5c2   :  { %v1488_v25 = vmax.f32 %v1470_v53, 0.0  ;;  %v1473_v57 = vadd.f32 %v1690_v35, %v1472_v56 }
 0x5c3   :  { %1610 = vst.msk [vmem:[%s2463_s12 + $0x30] sm:$0xff] %vm218_vm1, %v1490_v34  ;;  %v1491_v58 = vmax.f32 %v1481_v55, 0.0 }
 0x5c4   :  { %1608 = vst.msk [vmem:[%s2463_s12 + $0x20] sm:$0xff] %vm218_vm1, %v1488_v25  ;;  %v1489_v59 = vmax.f32 %v1473_v57, 0.0 }
 0x5c5   :  { %v1495_v60 = vpack.c.bf16 %v1491_v58, %v1490_v34  ;;  %1611 = vst.msk [vmem:[%s2463_s12 + $0x38] sm:$0xff] %vm218_vm1, %v1491_v58 }
 0x5c6   :  { %v1494_v32 = vpack.c.bf16 %v1489_v59, %v1488_v25  ;;  %1609 = vst.msk [vmem:[%s2463_s12 + $0x28] sm:$0xff] %vm218_vm1, %v1489_v59 }
 0x5c8   :  { %1976 = vmatprep.mubr.msk.bf16.mxu1 %vm218_vm1, %v1494_v32 }
 0x5c9   :  { %1977 = vmatmul.mubr.msk.bf16.gmra.mrb[52].mxu1 %vm218_vm1, %v1495_v60 }
 0x68c   :  { %v1974_v46 = vpop.f32.mrb[48].mxu1 }
 0x68d   :  { %v1574_v40 = vadd.f32 %v1974_v46, %v1697_v62  ;;  %v1565_v63 = vpop.f32.mrb[49].mxu1 }
 0x68e   :  { %v1566_v0 = vadd.f32 %v1697_v62, %v1565_v63  ;;  %v1975_v1 = vpop.f32.mrb[50].mxu1 }
 0x68f   :  { %1598 = vst.msk [vmem:[%s2462_s11 + $0x10] sm:$0xff] %vm914_vm4, %v1574_v40  ;;  %v1577_v51 = vadd.f32 %v1975_v1, %v1697_v62  ;;  %v1568_v3 = vpop.f32.mrb[51].mxu1 }
 0x690   :  { %1596 = vst.msk [vmem:[%s2462_s11] sm:$0xff] %vm914_vm4, %v1566_v0  ;;  %v1569_v61 = vadd.f32 %v1697_v62, %v1568_v3 }
 0x691   :  { %1599 = vst.msk [vmem:[%s2462_s11 + $0x18] sm:$0xff] %vm914_vm4, %v1577_v51 }
 0x692   :  { %1597 = vst.msk [vmem:[%s2462_s11 + $0x8] sm:$0xff] %vm914_vm4, %v1569_v61 }
 0x69c   :  { %v1978_v4 = vpop.f32.mrb[52].mxu1 }
 0x69d   :  { %v1590_v2 = vadd.f32 %v1978_v4, %v1697_v62  ;;  %v1581_v5 = vpop.f32.mrb[53].mxu1 }
 0x69e   :  { %v1582_v6 = vadd.f32 %v1697_v62, %v1581_v5  ;;  %v1979_v7 = vpop.f32.mrb[54].mxu1 }
 0x69f   :  { %1602 = vst.msk [vmem:[%s2462_s11 + $0x30] sm:$0xff] %vm914_vm4, %v1590_v2  ;;  %v1593_v8 = vadd.f32 %v1979_v7, %v1697_v62  ;;  %v1584_v9 = vpop.f32.mrb[55].mxu1 }
 0x6a0   :  { %1600 = vst.msk [vmem:[%s2462_s11 + $0x20] sm:$0xff] %vm914_vm4, %v1582_v6  ;;  %v1585_v11 = vadd.f32 %v1697_v62, %v1584_v9 }
 0x6a1   :  { %1603 = vst.msk [vmem:[%s2462_s11 + $0x38] sm:$0xff] %vm914_vm4, %v1593_v8 }
 0x6a2   :  { %1601 = vst.msk [vmem:[%s2462_s11 + $0x28] sm:$0xff] %vm914_vm4, %v1585_v11 }
 0x6a3   :  { %1620 = vsyncpa [#allocation3], 1 }
 0x6a4   :  { %1621 = vsyncpa [#allocation5], 1 }

</bundles_post_ra>
